<compile_context>
chip_gen: v6e
topology: v6e:2x2x1
jax: 0.10.0
libtpu: 0.0.40
codegen_flags: <defaults>
</compile_context>

<pallas_src>
import math

import jax
import jax.numpy as jnp
import numpy as np
from jax.experimental import pallas as pl
from jax.experimental.pallas import tpu as pltpu


def _row_tile(seq_len, d_model, itemsize, target_bytes=2 << 20):
    """Seq-axis tile: multiple of 8, ~<=2 MiB per (double-buffered) block, cap 512 rows.

    If seq_len fits in one tile we use the full extent (block == array dim is always
    legal, even when not a multiple of 8).
    """
    t = max(8, min(512, (target_bytes // max(1, d_model * itemsize)) // 8 * 8))
    return seq_len if seq_len <= t else t


# ----------------------------------------------------------------------------
# Inference path (is_training=False): deterministic sinusoid, rows
# [start_pos, start_pos + seq_len) generated directly in the kernel.
# ----------------------------------------------------------------------------
def _sinusoid_kernel(start_ref, inv_freq_ref, phase_ref, o_ref):
    rows = o_ref.shape[0]
    base = start_ref[0] + pl.program_id(0) * rows
    pos = (base + jax.lax.broadcasted_iota(jnp.int32, (rows, 1), 0)).astype(jnp.float32)
    # cos(x) == sin(x + pi/2): a single EUP transcendental per element.
    # Intermediates stay f32 (v5e EUP/VPU have no bf16 path); cast only at the store.
    o_ref[...] = jnp.sin(pos * inv_freq_ref[...] + phase_ref[...]).astype(o_ref.dtype)


def sinusoid_pos_embed(seq_len, d_model, start_pos, dtype=jnp.float32):
    assert d_model % 2 == 0, "d_model must be even (matches the torch reference loop)"
    itemsize = jnp.dtype(dtype).itemsize
    tile = _row_tile(seq_len, d_model, itemsize)
    num_tiles = pl.cdiv(seq_len, tile)

    # Hoisted per-column constants (computed once, in float64 then cast).
    col = np.arange(d_model)
    pair = (col & ~1).astype(np.float64)  # even j of each (sin, cos) pair
    inv_freq = np.exp(-(2.0 * pair / d_model) * math.log(10000.0)).astype(np.float32)
    phase = ((col & 1).astype(np.float64) * (np.pi / 2.0)).astype(np.float32)
    inv_freq = jnp.asarray(inv_freq)[None, :]
    phase = jnp.asarray(phase)[None, :]
    start = jnp.asarray([start_pos], dtype=jnp.int32)

    cost = pl.CostEstimate(
        flops=2 * seq_len * d_model,
        transcendentals=seq_len * d_model,
        bytes_accessed=seq_len * d_model * itemsize + 2 * d_model * 4 + 4,
    )

    # NOTE: for very long contexts (start_pos + seq_len in the tens of thousands) the
    # low-frequency columns lose f32 precision vs. a float64 reference (angle ~= pos).
    return pl.pallas_call(
        _sinusoid_kernel,
        out_shape=jax.ShapeDtypeStruct((seq_len, d_model), dtype),
        grid_spec=pltpu.PrefetchScalarGridSpec(
            num_scalar_prefetch=1,  # start_pos -> SMEM
            grid=(num_tiles,),
            in_specs=[
                pl.BlockSpec((1, d_model), lambda i, s: (0, 0)),  # inv_freq (fetched once)
                pl.BlockSpec((1, d_model), lambda i, s: (0, 0)),  # phase    (fetched once)
            ],
            out_specs=pl.BlockSpec((tile, d_model), lambda i, s: (i, 0)),
        ),
        compiler_params=pltpu.CompilerParams(dimension_semantics=("parallel",)),
        cost_estimate=cost,
    )(start, inv_freq, phase)


# ----------------------------------------------------------------------------
# Training path (is_training=True): learned (seq_maxlen, d_model) table, forward is a
# dynamic row slice. Table stays in HBM; only the needed rows are DMA'd per tile.
# ----------------------------------------------------------------------------
def _make_slice_kernel(tile_rows, tail_rows, num_tiles):
    def kernel(start_ref, table_ref, o_ref, sem):
        i = pl.program_id(0)
        src = start_ref[0] + i * tile_rows

        def copy(n_rows, dst):
            cp = pltpu.make_async_copy(table_ref.at[pl.ds(src, n_rows), :], dst, sem)
            cp.start()
            cp.wait()

        if tail_rows == 0:
            copy(tile_rows, o_ref)
        else:
            # Last (partial) tile: copy only the valid rows so the HBM-side read never
            # goes past start_pos + seq_len; the padded output rows are dropped by Pallas.
            @pl.when(i < num_tiles - 1)
            def _():
                copy(tile_rows, o_ref)

            @pl.when(i == num_tiles - 1)
            def _():
                copy(tail_rows, o_ref.at[pl.ds(0, tail_rows), :])

    return kernel


def learned_pos_embed(table, seq_len, start_pos):
    seq_maxlen, d_model = table.shape
    tile = _row_tile(seq_len, d_model, jnp.dtype(table.dtype).itemsize)
    num_tiles = pl.cdiv(seq_len, tile)
    tail = seq_len % tile
    start = jnp.asarray([start_pos], dtype=jnp.int32)

    return pl.pallas_call(
        _make_slice_kernel(tile, tail, num_tiles),
        out_shape=jax.ShapeDtypeStruct((seq_len, d_model), table.dtype),
        grid_spec=pltpu.PrefetchScalarGridSpec(
            num_scalar_prefetch=1,  # start_pos -> SMEM
            grid=(num_tiles,),
            in_specs=[pl.BlockSpec(memory_space=pl.ANY)],  # table stays in HBM
            out_specs=pl.BlockSpec((tile, d_model), lambda i, s: (i, 0)),
            scratch_shapes=[pltpu.SemaphoreType.DMA(())],
        ),
        compiler_params=pltpu.CompilerParams(dimension_semantics=("parallel",)),
    )(start, table)


class PositionEmbedding:
    """JAX/Pallas port of the PyTorch PositionEmbedding module."""

    def __init__(self, seq_maxlen, d_model, is_training=False, key=None,
                 dtype=jnp.float32):
        assert d_model % 2 == 0, "d_model must be even (torch reference writes j and j+1)"
        self.seq_maxlen = seq_maxlen
        self.d_model = d_model
        self.is_training = is_training
        self.dtype = dtype  # set to jnp.bfloat16 if the consumer uses bf16 embeddings
        if is_training:
            if key is None:
                key = jax.random.PRNGKey(0)
            # torch: weight.data.uniform_(-1, 1) -- deterministic synthetic init here.
            self.embedds = jax.random.uniform(
                key, (seq_maxlen, d_model), jnp.float32, -1.0, 1.0
            )
        else:
            self.embedds = None  # sinusoid is generated inside the kernel

    def __call__(self, x, start_pos=0):
        seq_len = x.shape[1]
        if not self.is_training:
            return sinusoid_pos_embed(seq_len, self.d_model, start_pos, self.dtype)
        return learned_pos_embed(self.embedds, seq_len, start_pos)


# ----------------------------------------------------------------------------
# Reference (mirrors the torch __init__ loop) for checking.
# ----------------------------------------------------------------------------
def _reference_table(seq_maxlen, d_model):
    tbl = np.zeros((seq_maxlen, d_model), dtype=np.float32)
    for i in range(seq_maxlen):
        for j in range(0, d_model, 2):
            tbl[i, j] = math.sin(i / math.pow(10000, 2 * j / d_model))
            tbl[i, j + 1] = math.cos(i / math.pow(10000, 2 * j / d_model))
    return tbl


if __name__ == "__main__":
    seq_maxlen, d_model = 64, 32
    batch, seq_len = 2, 8
    start_pos = 3

    key = jax.random.PRNGKey(0)
    kx, kp = jax.random.split(key)
    x = jax.random.normal(kx, (batch, seq_len, d_model), jnp.float32)

    # --- inference (default) path: sinusoid computed inside the Pallas kernel ---
    mod = PositionEmbedding(seq_maxlen, d_model, is_training=False)
    out = jax.block_until_ready(mod(x, start_pos=start_pos))
    ref = _reference_table(seq_maxlen, d_model)[start_pos : start_pos + seq_len, :]
    assert out.shape == (seq_len, d_model), out.shape
    np.testing.assert_allclose(np.asarray(out), ref, rtol=1e-4, atol=1e-4)

    # --- training path: HBM-resident table, per-tile DMA of only the needed rows ---
    mod_t = PositionEmbedding(seq_maxlen, d_model, is_training=True, key=kp)
    out_t = jax.block_until_ready(mod_t(x, start_pos=start_pos))
    ref_t = np.asarray(mod_t.embedds)[start_pos : start_pos + seq_len, :]
    np.testing.assert_allclose(np.asarray(out_t), ref_t, rtol=0, atol=0)

    print("KERNEL_OK")
</pallas_src>

<mosaic_0001>
module attributes {stable_mosaic.version = 11 : i64} {
  func.func @_sinusoid_kernel(%arg0: i32, %arg1: memref<1xi32, #tpu.memory_space<smem>>, %arg2: memref<1x32xf32, #tpu.memory_space<vmem>>, %arg3: memref<1x32xf32, #tpu.memory_space<vmem>>, %arg4: memref<8x32xf32, #tpu.memory_space<vmem>>) attributes {dimension_semantics = [#tpu.dimension_semantics<parallel>], iteration_bounds = array<i64: 1>, scalar_prefetch = 1 : i64, scratch_operands = 0 : i64, tpu.core_type = #tpu.core_type<tc>, window_params = [{pipeline_mode = #tpu.pipeline_mode<synchronous>, transform_indices = @transform_0, window_bounds = array<i64: 1, 32>}, {pipeline_mode = #tpu.pipeline_mode<synchronous>, transform_indices = @transform_1, window_bounds = array<i64: 1, 32>}, {transform_indices = @transform_2, window_bounds = array<i64: 8, 32>}]} {
    %c0 = arith.constant 0 : index
    %0 = memref.load %arg1[%c0] : memref<1xi32, #tpu.memory_space<smem>>
    %c8_i32 = arith.constant 8 : i32
    %1 = arith.muli %arg0, %c8_i32 : i32
    %2 = arith.addi %0, %1 : i32
    %3 = tpu.iota {dimensions = array<i32: 0>} : vector<8x1xi32>
    %4 = vector.broadcast %2 : i32 to vector<8x1xi32>
    %5 = arith.addi %4, %3 : vector<8x1xi32>
    %6 = arith.sitofp %5 : vector<8x1xi32> to vector<8x1xf32>
    %c0_0 = arith.constant 0 : index
    %c0_1 = arith.constant 0 : index
    %7 = vector.load %arg2[%c0_0, %c0_1] : memref<1x32xf32, #tpu.memory_space<vmem>>, vector<1x32xf32>
    %8 = vector.broadcast %6 : vector<8x1xf32> to vector<8x32xf32>
    %9 = vector.broadcast %7 : vector<1x32xf32> to vector<8x32xf32>
    %10 = arith.mulf %8, %9 : vector<8x32xf32>
    %c0_2 = arith.constant 0 : index
    %c0_3 = arith.constant 0 : index
    %11 = vector.load %arg3[%c0_2, %c0_3] : memref<1x32xf32, #tpu.memory_space<vmem>>, vector<1x32xf32>
    %12 = vector.broadcast %11 : vector<1x32xf32> to vector<8x32xf32>
    %13 = arith.addf %10, %12 : vector<8x32xf32>
    %14 = math.sin %13 : vector<8x32xf32>
    %c0_4 = arith.constant 0 : index
    %c0_5 = arith.constant 0 : index
    %15 = vector.load %arg4[%c0_4, %c0_5] : memref<8x32xf32, #tpu.memory_space<vmem>>, vector<8x32xf32>
    tpu.vector_store %arg4[%c0_4, %c0_5], %14 {strides = array<i32>} : memref<8x32xf32, #tpu.memory_space<vmem>>, vector<8x32xf32>,
    return
  }
  func.func @transform_0(%arg0: i32, %arg1: memref<1xi32, #tpu.memory_space<smem>>) -> (i32, i32) {
    %c0_i32 = arith.constant 0 : i32
    %c0_i32_0 = arith.constant 0 : i32
    %c0_i32_1 = arith.constant 0 : i32
    return %c0_i32, %c0_i32_0 : i32, i32
  }
  func.func @transform_1(%arg0: i32, %arg1: memref<1xi32, #tpu.memory_space<smem>>) -> (i32, i32) {
    %c0_i32 = arith.constant 0 : i32
    %c0_i32_0 = arith.constant 0 : i32
    %c0_i32_1 = arith.constant 0 : i32
    return %c0_i32, %c0_i32_0 : i32, i32
  }
  func.func @transform_2(%arg0: i32, %arg1: memref<1xi32, #tpu.memory_space<smem>>) -> (i32, i32) {
    %c0_i32 = arith.constant 0 : i32
    %c0_i32_0 = arith.constant 0 : i32
    return %arg0, %c0_i32 : i32, i32
  }
}

</mosaic_0001>

<bundles_post_ra>
// kernel: tpu_custom_call.1
= control target key start
LH: loop header
LB: loop body
LE: loop exit
PB: predicated region body
PF: predicated region fallthrough
CT: control target
= control target key end

     0   :  { %v17_v0 = vlaneseq  ;;  %s261_s0 = inlined_call_operand.<no memory space> [shape: s32[1], index: 0, kind: input, shape index: {}]   ;;  %s262_s1 = inlined_call_operand.vmem [shape: f32[1,32], index: 1, kind: input, shape index: {}]   ;;  %s263_s2 = inlined_call_operand.vmem [shape: f32[1,32], index: 2, kind: input, shape index: {}]   ;;  %s264_s3 = inlined_call_operand.hbm [shape: f32[8,32], index: 3, kind: output, shape index: {}]  }
   0x1   :  { %v19_v1 = vstv %s261_s0 }
   0x2   :  { %v18_v2 = vshrl.u32 %v17_v0, 7 }
   0x3   :  { %9 = vsyncpa [#allocation5], 0  ;;  %v158_v4 = vld [vmem:[%s262_s1] ss:$0 sm:$0xff]  ;;  %v201_v20 = vmov 683565275  }
   0x4   :  { %v20_v3 = vadd.s32 %v19_v1, %v18_v2  ;;  %v159_v6 = vld [vmem:[%s263_s2] ss:$0 sm:$0xff]  ;;  %v202_v22 = vmov 2475754826   ;;  %v203_v24 = vmov 2131351028  }
   0x5   :  { %v204_v26 = vmov 2102212464   ;;  %v205_v28 = vmov 920167782   ;;  %v206_v35 = vmov 1326507024  }
   0x6   :  { %v21_v5 = vcvt.s32.f32 %v20_v3  ;;  %s207_s0 = smov [#allocation4]   ;;  %vm142_vm13 = vcmask 261120  }
   0x7   :  { %s150_s1 = sshll.u32 %s207_s0, 4  ;;  %s151_s1 = int_to_ptr.vmem [resolvable:$true] %s150_s1 }
   0x8   :  { %v29_v7 = vmul.f32 %v158_v4, %v21_v5  ;;  %s179_s2 = scalar_lea.vmem %s151_s1, 128  ;;  %p184_p1 = scmp.lt.s32.totalorder %s151_s1, %s151_s1 }
   0x9   :  { %p180_p0 = scmp.ne.s32.totalorder %s151_s1, %s179_s2  ;;  %p185_p2 = scmp.lt.s32.totalorder %s179_s2, %s179_s2 }
   0xa   :  { %v237_v8 = vadd.f32 %v159_v6, %v29_v7 }
   0xb   :  { %p186_p3 = por %p185_p2, %p184_p1 }
   0xc   :  { %v41_v9 = vand.u32 2139095040, %v237_v8  ;;  %v38_v11 = vand.u32 2147483647, %v237_v8  ;;  %vm40_vm7 = vcmp.lt.s32.totalorder %v237_v8, 0  ;;  %vm130_vm12 = vweird.f32 %v237_v8 }
   0xd   :  { %p187_p4 = pnand %p186_p3, %p180_p0 }
   0xe   :  { %v42_v10 = vshrl.u32 %v41_v9, 23  ;;  %v45_v14 = vand.u32 8388607, %v38_v11  ;;  %vm39_vm8 = vcmp.le.f32.partialorder %v38_v11, 0.7853982 }
  0x10   :  { %v160_v12 = vadd.s32 4294967169, %v42_v10  ;;  %v46_v17 = vor.u32 8388608, %v45_v14 }
  0x12   :  { %v48_v13 = vadd.s32 1, %v160_v12  ;;  %v86_v37 = vshll.u32 %v46_v17, 8 }
  0x14   :  { %vm49_vm0 = vcmp.gt.s32.totalorder %v48_v13, 0 }
  0x15   :  { %v50_v15 = vsel %vm49_vm0, %v48_v13, 0 }
  0x16   :  { %v52_v16 = vand.u32 31, %v50_v15  ;;  %v51_v18 = vshrl.u32 %v50_v15, 5 }
  0x18   :  { %v53_v19 = vsub.s32 32, %v52_v16  ;;  %v55_v21 = vshll.u32 %v201_v20, %v52_v16  ;;  %v58_v23 = vshll.u32 %v202_v22, %v52_v16  ;;  %v61_v25 = vshll.u32 %v203_v24, %v52_v16 }
  0x19   :  { %v64_v27 = vshll.u32 %v204_v26, %v52_v16  ;;  %v67_v29 = vshll.u32 %v205_v28, %v52_v16  ;;  %vm70_vm1 = vcmp.lt.s32.totalorder %v51_v18, 1  ;;  %vm73_vm2 = vcmp.lt.s32.totalorder %v51_v18, 4 }
  0x1a   :  { %v54_v30 = vshrl.u32 %v201_v20, %v53_v19  ;;  %v56_v31 = vshrl.u32 %v202_v22, %v53_v19  ;;  %v59_v32 = vshrl.u32 %v203_v24, %v53_v19  ;;  %v62_v33 = vshrl.u32 %v204_v26, %v53_v19 }
  0x1b   :  { %v65_v34 = vshrl.u32 %v205_v28, %v53_v19  ;;  %v68_v36 = vshrl.u32 %v206_v35, %v53_v19  ;;  %vm71_vm3 = vcmp.lt.s32.totalorder %v51_v18, 2  ;;  %vm72_vm4 = vcmp.lt.s32.totalorder %v51_v18, 3 }
  0x1c   :  { %v57_v38 = vor.u32 %v56_v31, %v55_v21  ;;  %v60_v39 = vor.u32 %v59_v32, %v58_v23  ;;  %v63_v40 = vor.u32 %v62_v33, %v61_v25 }
  0x1d   :  { %v66_v41 = vor.u32 %v65_v34, %v64_v27  ;;  %v69_v42 = vor.u32 %v68_v36, %v67_v29 }
  0x1e   :  { %v74_v43 = vsel %vm70_vm1, %v54_v30, %v57_v38  ;;  %v75_v44 = vsel %vm73_vm2, %v63_v40, 2102212464  ;;  %v78_v45 = vsel %vm70_vm1, %v57_v38, %v60_v39  ;;  %v82_v46 = vsel %vm70_vm1, %v60_v39, %v63_v40 }
  0x1f   :  { %v76_v47 = vsel %vm72_vm4, %v60_v39, %v75_v44  ;;  %v79_v48 = vsel %vm73_vm2, %v66_v41, 920167782  ;;  %v83_v49 = vsel %vm73_vm2, %v69_v42, 1326507024 }
  0x20   :  { %v80_v50 = vsel %vm72_vm4, %v63_v40, %v79_v48  ;;  %v84_v51 = vsel %vm72_vm4, %v66_v41, %v83_v49  ;;  %v77_v52 = vsel %vm71_vm3, %v74_v43, %v76_v47 }
  0x21   :  { %v81_v53 = vsel %vm71_vm3, %v78_v45, %v80_v50  ;;  %v85_v54 = vsel %vm71_vm3, %v82_v46, %v84_v51  ;;  %v93_v59 = vmul.u32 %v86_v37, %v77_v52 }
  0x22   :  { %v243_v55 = vmul.u32.u64.low %v86_v37, %v85_v54  ;;  %v244_v56 = vmul.u32.u64.high %v86_v37, %v85_v54, %v243_v55  ;;  %v246_v57 = vmul.u32.u64.low %v86_v37, %v81_v53  ;;  %v247_v58 = vmul.u32.u64.high %v86_v37, %v81_v53, %v246_v57 }
  0x24   :  { %vm95_vm5 = vc.u32 %v244_v56, %v246_v57  ;;  %v96_v60 = vadd.s32 1, %v247_v58  ;;  %v94_v7 = vadd.s32 %v246_v57, %v244_v56 }
  0x26   :  { %v97_v61 = vsel %vm95_vm5, %v96_v60, %v247_v58 }
  0x27   :  { %v98_v62 = vadd.s32 %v97_v61, %v93_v59 }
  0x29   :  { %v99_v63 = vadd.s32 536870912, %v98_v62 }
  0x2b   :  { %v100_v0 = vshrl.u32 %v99_v63, 30 }
  0x2d   :  { %v101_v1 = vshll.u32 %v100_v0, 30  ;;  %v124_v22 = vsub.s32 4, %v100_v0 }
  0x2f   :  { %v102_v2 = vsub.s32 %v98_v62, %v101_v1  ;;  %v125_v25 = vsel %vm40_vm7, %v124_v22, %v100_v0 }
  0x30   :  { %v127_v27 = vsel %vm39_vm8, 0, %v125_v25 }
  0x31   :  { %v104_v3 = vsub.s32 0, %v102_v2  ;;  %v131_v28 = vadd.s32 3, %v127_v27 }
  0x33   :  { %v161_v4 = vmin.u32 %v104_v3, %v102_v2  ;;  %v132_v29 = vand.u32 3, %v131_v28 }
  0x35   :  { %v106_v5 = vclz %v161_v4  ;;  %vm137_vm9 = vcmp.eq.s32.totalorder %v132_v29, 2  ;;  %vm134_vm10 = vcmp.eq.s32.totalorder %v132_v29, 0  ;;  %vm133_vm11 = vcmp.lt.s32.totalorder %v132_v29, 2 }
  0x37   :  { %v162_v6 = vadd.s32 4294967294, %v106_v5 }
  0x39   :  { %vm163_vm6 = vcmp.lt.s32.totalorder %v162_v6, 0 }
  0x3a   :  { %v109_v9 = vsel %vm163_vm6, 0, %v162_v6 }
  0x3b   :  { %v110_v10 = vsub.s32 32, %v109_v9  ;;  %v111_v12 = vshll.u32 %v102_v2, %v109_v9  ;;  %v114_v13 = vsub.s32 4294967266, %v109_v9 }
  0x3d   :  { %v112_v14 = vshrl.u32 %v94_v7, %v110_v10  ;;  %v115_v15 = vadd.s32 127, %v114_v13 }
  0x3f   :  { %v113_v16 = vor.u32 %v112_v14, %v111_v12  ;;  %v116_v17 = vshll.u32 %v115_v15, 23 }
  0x41   :  { %v117_v18 = vor.u32 4788187, %v116_v17  ;;  %v120_v19 = vcvt.s32.f32 %v113_v16 }
  0x43   :  { %v118_v20 = vand.u32 2147483647, %v117_v18 }
  0x45   :  { %v121_v21 = vmul.f32 %v120_v19, %v118_v20 }
  0x47   :  { %v122_v23 = vxor.u32 2147483648, %v121_v21 }
  0x49   :  { %v123_v24 = vsel %vm40_vm7, %v122_v23, %v121_v21 }
  0x4a   :  { %v126_v26 = vsel %vm39_vm8, %v237_v8, %v123_v24 }
  0x4b   :  { %175 = vcosq.f32 %v126_v26 }
  0x4c   :  { %177 = vsinq.f32 %v126_v26 }
  0x58   :  { %v176_v30 = vpop.eup %175 }
  0x59   :  { %v178_v31 = vpop.eup %177  ;;  %v138_v32 = vxor.u32 2147483648, %v176_v30 }
  0x5a   :  { %v135_v33 = vxor.u32 2147483648, %v178_v31 }
  0x5b   :  { %v139_v11 = vsel %vm137_vm9, %v138_v32, %v178_v31 }
  0x5c   :  { %v136_v34 = vsel %vm134_vm10, %v176_v30, %v135_v33 }
  0x5d   :  { %v140_v35 = vsel %vm133_vm11, %v136_v34, %v139_v11 }
  0x5e   :  { %v141_v36 = vsel %vm130_vm12, nan, %v140_v35 }
  0x5f   :  { %143 = vst.msk [vmem:[#allocation4] sm:$0xff] %vm142_vm13, %v141_v36 }
  0x60   :  { %190 = shalt.err (!%p187_p4)
}
  0x61   :  { %153 = dma.vmem_to_hbm [thread:$0]  %s151_s1, 128, %s264_s3, [#allocation5]  }
  0x62   :  { %199 = dma.done.wait [#allocation5], 128  }
  0x63   :  { %200 = vsyncadd [#allocation5], 4294967168 }
  0x64   :  { %157 = vsyncpa [#allocation5], 1 }

</bundles_post_ra>
